<compile_context>
chip_gen: v5e
topology: v5e:2x2
jax: 0.10.0
libtpu: 0.0.40
codegen_flags: <defaults>
</compile_context>

<pallas_src>
import functools

import jax
import jax.numpy as jnp
from jax.experimental import pallas as pl
from jax.experimental.pallas import tpu as pltpu


# ---------------------------------------------------------------------------
# Hardware-aware sizing
# ---------------------------------------------------------------------------

def _vmem_capacity_bytes():
    try:
        return int(pltpu.get_tpu_info().vmem_capacity_bytes)
    except Exception:
        return 128 * 1024 * 1024          # v4/v5e/v6e default


def _generation_params():
    """Returns (target_block_bytes, vmem_limit_bytes, num_tensorcores)."""
    cap = _vmem_capacity_bytes()
    # v7x: 64 MiB VMEM per TensorCore, 2 TCs/chip.  v4/v5e/v6e: 128 MiB, 1 TC.
    num_tc = 2 if cap <= 64 * 1024 * 1024 else 1
    target_block = max(2 * 1024 * 1024, min(cap // 16, 16 * 1024 * 1024))
    vmem_limit = max(32 * 1024 * 1024, min((cap * 3) // 4, 96 * 1024 * 1024))
    return target_block, vmem_limit, num_tc


def _choose_batch_block(B, per_item_bytes, target_block_bytes, num_tc):
    """Largest Bb with Bb | B and one (Bb, C, HW) slab <= target_block_bytes."""
    bb = max(1, min(B, target_block_bytes // max(per_item_bytes, 1)))
    while B % bb != 0:
        bb -= 1
    # On 2-TC chips (v7x) prefer an even grid-step count so both cores get
    # work, but never shrink a block below ~1 MiB to achieve it.
    if num_tc > 1 and (B // bb) % 2 != 0:
        for cand in range(bb - 1, 0, -1):
            if B % cand == 0 and (B // cand) % 2 == 0 and \
                    cand * per_item_bytes >= (1 << 20):
                bb = cand
                break
    return bb


def _choose_hw_tile(HW, C, itemsize, target_block_bytes):
    """HW chunk for the split path: full HW or a multiple of 128 lanes."""
    per_col = max(C * itemsize, 1)
    t = max(1, target_block_bytes // per_col)
    if t >= HW:
        return HW
    t = max(128, (t // 128) * 128)
    return min(t, HW)


# ---------------------------------------------------------------------------
# Kernels
# ---------------------------------------------------------------------------

def _se_fused_kernel(x_ref, w1_ref, w2_ref, o_ref):
    """Whole-image block: pool + fc1 + relu + fc2 + hsigmoid + rescale."""
    # x_ref/o_ref: (Bb, C, HW); w1_ref: (C, Cr) pre-scaled by 1/HW;
    # w2_ref: (Cr, C) pre-scaled by 1/6.
    # squeeze: pooled sum over the spatial (lane) axis, f32 accumulation; the
    # cast is fused into the reduce -- no full f32 tile is kept live.
    y = jnp.sum(x_ref[...].astype(jnp.float32), axis=-1)               # (Bb, C)
    # excitation: tiny MXU matmuls (irrelevant to the HBM roofline).
    h = jnp.dot(y, w1_ref[...], preferred_element_type=jnp.float32)    # (Bb, Cr)
    h = jnp.maximum(h, 0.0)
    s = jnp.dot(h, w2_ref[...], preferred_element_type=jnp.float32)    # (Bb, C)
    # hsigmoid with the /6 folded into w2: clamp(s + 0.5, 0, 1).
    s = jnp.clip(s + 0.5, 0.0, 1.0)
    # rescale: re-read x and multiply in the input dtype; only the tiny
    # (Bb, C) scale is cast/relayouted before the lane broadcast.
    o_ref[...] = x_ref[...] * s.astype(o_ref.dtype)[:, :, None]


def _se_pool_excite_kernel(x_ref, w1_ref, w2_ref, s_ref, *, hw_total, hw_tile):
    """Split path A: pooled-sum reduction over HW chunks + excitation."""
    # x_ref: (1, C, Thw); s_ref: (1, 1, C) f32 (doubles as the accumulator).
    h = pl.program_id(1)

    @pl.when(h == 0)
    def _init():
        s_ref[...] = jnp.zeros_like(s_ref)

    # Mask the out-of-bounds columns of a ragged final chunk before summing.
    col = jax.lax.broadcasted_iota(jnp.int32, x_ref.shape, 2)
    xf = jnp.where(col < (hw_total - h * hw_tile),
                   x_ref[...].astype(jnp.float32), 0.0)
    s_ref[...] += jnp.sum(xf, axis=2)[:, None, :]                      # (1,1,C)

    @pl.when(h == pl.num_programs(1) - 1)
    def _finalize():
        y = s_ref[...][:, 0, :]                                        # (1, C)
        z = jnp.dot(y, w1_ref[...], preferred_element_type=jnp.float32)
        z = jnp.maximum(z, 0.0)
        s = jnp.dot(z, w2_ref[...], preferred_element_type=jnp.float32)
        s_ref[...] = jnp.clip(s + 0.5, 0.0, 1.0)[:, None, :]


def _se_rescale_kernel(s_ref, x_ref, o_ref):
    """Split path B: elementwise channel-wise rescale, lane-dense over HW."""
    scale = s_ref[...][:, 0, :].astype(o_ref.dtype)                    # (1, C)
    o_ref[...] = x_ref[...] * scale[:, :, None]


# ---------------------------------------------------------------------------
# Wrapper
# ---------------------------------------------------------------------------

def se_module(x_nchw, w1, w2, *, target_block_bytes=None):
    """SEModule forward.  x: (B, C, H, W); w1: (C//r, C); w2: (C, C//r)."""
    B, C, H, W = x_nchw.shape
    HW = H * W
    Cr = w1.shape[0]
    itemsize = jnp.dtype(x_nchw.dtype).itemsize

    auto_target, vmem_limit, num_tc = _generation_params()
    if target_block_bytes is None:
        target_block_bytes = auto_target

    # Free reshape (no data movement): stay NCHW, merge H,W -> HW.
    x_flat = x_nchw.reshape(B, C, HW)

    # Fold mean's 1/HW into fc1 and hsigmoid's 1/6 into fc2 (tiny weights).
    w1_t = (jnp.transpose(w1) * (1.0 / HW)).astype(w1.dtype)   # (C, Cr)
    w2_t = (jnp.transpose(w2) * (1.0 / 6.0)).astype(w2.dtype)  # (Cr, C)

    per_item = C * HW * itemsize
    # Split when a single image does not fit the block budget, or when B == 1
    # and the image is big enough that HW-chunking restores pipelining.
    use_split = (per_item > target_block_bytes) or \
                (B == 1 and per_item > (1 << 20))

    if not use_split:
        Bb = _choose_batch_block(B, per_item, target_block_bytes, num_tc)
        out = pl.pallas_call(
            _se_fused_kernel,
            out_shape=jax.ShapeDtypeStruct((B, C, HW), x_nchw.dtype),
            grid_spec=pltpu.PrefetchScalarGridSpec(
                num_scalar_prefetch=0,
                grid=(B // Bb,),
                in_specs=[
                    pl.BlockSpec((Bb, C, HW), lambda b: (b, 0, 0)),
                    # constant index_map: weights DMA'd once, stay resident
                    pl.BlockSpec((C, Cr), lambda b: (0, 0)),
                    pl.BlockSpec((Cr, C), lambda b: (0, 0)),
                ],
                out_specs=pl.BlockSpec((Bb, C, HW), lambda b: (b, 0, 0)),
            ),
            compiler_params=pltpu.CompilerParams(
                dimension_semantics=("parallel",),
                vmem_limit_bytes=vmem_limit,
            ),
        )(x_flat, w1_t, w2_t)
        return out.reshape(B, C, H, W)

    # ---- split path: pool/excite reduction kernel + lane-dense rescale ----
    Thw = _choose_hw_tile(HW, C, itemsize, target_block_bytes)
    n_hw = (HW + Thw - 1) // Thw

    scale = pl.pallas_call(
        functools.partial(_se_pool_excite_kernel, hw_total=HW, hw_tile=Thw),
        out_shape=jax.ShapeDtypeStruct((B, 1, C), jnp.float32),
        grid_spec=pltpu.PrefetchScalarGridSpec(
            num_scalar_prefetch=0,
            grid=(B, n_hw),                      # reduction (HW) axis last
            in_specs=[
                pl.BlockSpec((1, C, Thw), lambda b, h: (b, 0, h)),
                pl.BlockSpec((C, Cr), lambda b, h: (0, 0)),
                pl.BlockSpec((Cr, C), lambda b, h: (0, 0)),
            ],
            out_specs=pl.BlockSpec((1, 1, C), lambda b, h: (b, 0, 0)),
        ),
        compiler_params=pltpu.CompilerParams(
            dimension_semantics=("parallel", "arbitrary"),
            vmem_limit_bytes=vmem_limit,
        ),
    )(x_flat, w1_t, w2_t)

    out = pl.pallas_call(
        _se_rescale_kernel,
        out_shape=jax.ShapeDtypeStruct((B, C, HW), x_nchw.dtype),
        grid_spec=pltpu.PrefetchScalarGridSpec(
            num_scalar_prefetch=0,
            grid=(B, n_hw),
            in_specs=[
                pl.BlockSpec((1, 1, C), lambda b, h: (b, 0, 0)),
                pl.BlockSpec((1, C, Thw), lambda b, h: (b, 0, h)),
            ],
            out_specs=pl.BlockSpec((1, C, Thw), lambda b, h: (b, 0, h)),
        ),
        compiler_params=pltpu.CompilerParams(
            dimension_semantics=("parallel", "parallel"),
            vmem_limit_bytes=vmem_limit,
        ),
    )(scale, x_flat)
    return out.reshape(B, C, H, W)


def se_module_ref(x, w1, w2):
    """Pure-JAX reference matching the PyTorch forward."""
    y = jnp.mean(x, axis=(2, 3))                           # (B, C)
    y = jnp.maximum(y @ w1.T, 0.0)                         # (B, C//r)
    y = y @ w2.T                                           # (B, C)
    y = jnp.minimum(jnp.maximum(y + 3.0, 0.0), 6.0) / 6.0  # hsigmoid
    return x * y[:, :, None, None]


if __name__ == "__main__":
    key = jax.random.PRNGKey(0)
    kx, k1, k2, kx2, k3, k4 = jax.random.split(key, 6)

    # --- primary test: fused path (B=2, C=16, H=W=8, reduction=4) ---
    B, C, H, W, reduction = 2, 16, 8, 8, 4
    x = jax.random.normal(kx, (B, C, H, W), dtype=jnp.float32)
    # nn.Linear(channel, channel // reduction, bias=False) -> weight (C//r, C)
    w1 = jax.random.normal(k1, (C // reduction, C), dtype=jnp.float32) * 0.25
    # nn.Linear(channel // reduction, channel, bias=False) -> weight (C, C//r)
    w2 = jax.random.normal(k2, (C, C // reduction), dtype=jnp.float32) * 0.25

    out = jax.block_until_ready(se_module(x, w1, w2))
    ref = se_module_ref(x, w1, w2)
    assert out.shape == (B, C, H, W)
    assert jnp.allclose(out, ref, atol=1e-5, rtol=1e-5)

    # --- secondary test: split path, forced via a tiny block budget; HW=576
    #     tiled in 256-wide chunks (ragged last chunk exercises masking) ---
    B2, C2, H2, W2 = 1, 32, 24, 24
    x2 = jax.random.normal(kx2, (B2, C2, H2, W2), dtype=jnp.float32)
    w1b = jax.random.normal(k3, (C2 // reduction, C2), dtype=jnp.float32) * 0.25
    w2b = jax.random.normal(k4, (C2, C2 // reduction), dtype=jnp.float32) * 0.25
    out2 = jax.block_until_ready(
        se_module(x2, w1b, w2b, target_block_bytes=32 * 1024))
    ref2 = se_module_ref(x2, w1b, w2b)
    assert out2.shape == (B2, C2, H2, W2)
    assert jnp.allclose(out2, ref2, atol=1e-5, rtol=1e-5)

    print("KERNEL_OK")
</pallas_src>

<mosaic_0001>
module attributes {stable_mosaic.version = 11 : i64} {
  func.func @_se_fused_kernel(%arg0: i32, %arg1: memref<2x16x64xf32, #tpu.memory_space<vmem>>, %arg2: memref<16x4xf32, #tpu.memory_space<vmem>>, %arg3: memref<4x16xf32, #tpu.memory_space<vmem>>, %arg4: memref<2x16x64xf32, #tpu.memory_space<vmem>>) attributes {dimension_semantics = [#tpu.dimension_semantics<parallel>], iteration_bounds = array<i64: 1>, scalar_prefetch = 0 : i64, scratch_operands = 0 : i64, tpu.core_type = #tpu.core_type<tc>, window_params = [{transform_indices = @transform_0, window_bounds = array<i64: 2, 16, 64>}, {pipeline_mode = #tpu.pipeline_mode<synchronous>, transform_indices = @transform_1, window_bounds = array<i64: 16, 4>}, {pipeline_mode = #tpu.pipeline_mode<synchronous>, transform_indices = @transform_2, window_bounds = array<i64: 4, 16>}, {transform_indices = @transform_3, window_bounds = array<i64: 2, 16, 64>}]} {
    %c0 = arith.constant 0 : index
    %c0_0 = arith.constant 0 : index
    %c0_1 = arith.constant 0 : index
    %0 = vector.load %arg1[%c0, %c0_0, %c0_1] : memref<2x16x64xf32, #tpu.memory_space<vmem>>, vector<2x16x64xf32>
    %cst = arith.constant dense<0.000000e+00> : vector<2x16xf32>
    %1 = vector.multi_reduction <add>, %0, %cst [2] : vector<2x16x64xf32> to vector<2x16xf32>
    %c0_2 = arith.constant 0 : index
    %c0_3 = arith.constant 0 : index
    %2 = vector.load %arg2[%c0_2, %c0_3] : memref<16x4xf32, #tpu.memory_space<vmem>>, vector<16x4xf32>
    %cst_4 = arith.constant dense<0.000000e+00> : vector<2x4xf32>
    %3 = tpu.matmul %1, %2, %cst_4 {dimension_numbers = #tpu.dot_dimension_numbers<[1], [0], [0], [1], [0, 0, 1, 1], [], []>} : vector<2x16xf32>, vector<16x4xf32>, vector<2x4xf32> -> vector<2x4xf32>
    %cst_5 = arith.constant 0.000000e+00 : f32
    %4 = vector.broadcast %cst_5 : f32 to vector<2x4xf32>
    %5 = arith.maximumf %3, %4 : vector<2x4xf32>
    %c0_6 = arith.constant 0 : index
    %c0_7 = arith.constant 0 : index
    %6 = vector.load %arg3[%c0_6, %c0_7] : memref<4x16xf32, #tpu.memory_space<vmem>>, vector<4x16xf32>
    %cst_8 = arith.constant dense<0.000000e+00> : vector<2x16xf32>
    %7 = tpu.matmul %5, %6, %cst_8 {dimension_numbers = #tpu.dot_dimension_numbers<[1], [0], [0], [1], [0, 0, 1, 1], [], []>} : vector<2x4xf32>, vector<4x16xf32>, vector<2x16xf32> -> vector<2x16xf32>
    %cst_9 = arith.constant 5.000000e-01 : f32
    %8 = vector.broadcast %cst_9 : f32 to vector<2x16xf32>
    %9 = arith.addf %7, %8 : vector<2x16xf32>
    %cst_10 = arith.constant 0.000000e+00 : f32
    %cst_11 = arith.constant 1.000000e+00 : f32
    %10 = vector.broadcast %cst_10 : f32 to vector<2x16xf32>
    %11 = arith.maximumf %10, %9 : vector<2x16xf32>
    %12 = vector.broadcast %cst_11 : f32 to vector<2x16xf32>
    %13 = arith.minimumf %12, %11 : vector<2x16xf32>
    %c0_12 = arith.constant 0 : index
    %c0_13 = arith.constant 0 : index
    %c0_14 = arith.constant 0 : index
    %14 = vector.load %arg1[%c0_12, %c0_13, %c0_14] : memref<2x16x64xf32, #tpu.memory_space<vmem>>, vector<2x16x64xf32>
    %15 = vector.shape_cast %13 : vector<2x16xf32> to vector<2x16x1xf32>
    %16 = vector.broadcast %15 : vector<2x16x1xf32> to vector<2x16x64xf32>
    %17 = arith.mulf %14, %16 : vector<2x16x64xf32>
    %c0_15 = arith.constant 0 : index
    %c0_16 = arith.constant 0 : index
    %c0_17 = arith.constant 0 : index
    %18 = vector.load %arg4[%c0_15, %c0_16, %c0_17] : memref<2x16x64xf32, #tpu.memory_space<vmem>>, vector<2x16x64xf32>
    tpu.vector_store %arg4[%c0_15, %c0_16, %c0_17], %17 {strides = array<i32>} : memref<2x16x64xf32, #tpu.memory_space<vmem>>, vector<2x16x64xf32>,
    return
  }
  func.func @transform_0(%arg0: i32) -> (i32, i32, i32) {
    %c0_i32 = arith.constant 0 : i32
    %c0_i32_0 = arith.constant 0 : i32
    %c0_i32_1 = arith.constant 0 : i32
    return %arg0, %c0_i32, %c0_i32_0 : i32, i32, i32
  }
  func.func @transform_1(%arg0: i32) -> (i32, i32) {
    %c0_i32 = arith.constant 0 : i32
    %c0_i32_0 = arith.constant 0 : i32
    %c0_i32_1 = arith.constant 0 : i32
    return %c0_i32, %c0_i32_0 : i32, i32
  }
  func.func @transform_2(%arg0: i32) -> (i32, i32) {
    %c0_i32 = arith.constant 0 : i32
    %c0_i32_0 = arith.constant 0 : i32
    %c0_i32_1 = arith.constant 0 : i32
    return %c0_i32, %c0_i32_0 : i32, i32
  }
  func.func @transform_3(%arg0: i32) -> (i32, i32, i32) {
    %c0_i32 = arith.constant 0 : i32
    %c0_i32_0 = arith.constant 0 : i32
    %c0_i32_1 = arith.constant 0 : i32
    return %arg0, %c0_i32, %c0_i32_0 : i32, i32, i32
  }
}

</mosaic_0001>

<bundles_post_ra>
// kernel: tpu_custom_call.1
= control target key start
LH: loop header
LB: loop body
LE: loop exit
PB: predicated region body
PF: predicated region fallthrough
CT: control target
= control target key end

     0   :  { %8 = vsyncpa [#allocation3], 0  ;;  %s299_s0 = inlined_call_operand.hbm [shape: f32[2,16,64], index: 0, kind: input, shape index: {}]   ;;  %s300_s1 = inlined_call_operand.vmem [shape: f32[16,4], index: 1, kind: input, shape index: {}]   ;;  %s301_s2 = inlined_call_operand.vmem [shape: f32[4,16], index: 2, kind: input, shape index: {}]   ;;  %s302_s3 = inlined_call_operand.hbm [shape: f32[2,16,64], index: 3, kind: output, shape index: {}]  }
   0x1   :  { %9 = vsyncpa [#allocation4], 0  ;;  %s14_s14 = sshll.u32 %s299_s0, 4  ;;  %s238_s15 = smov [#allocation2]   ;;  %s15_s14 = int_to_ptr.hbm [resolvable:$true] %s14_s14 }
   0x2   :  { %s16_s16 = sshll.u32 %s238_s15, 4  ;;  %s239_s17 = smov 128   ;;  %s17_s16 = int_to_ptr.vmem [resolvable:$true] %s16_s16 }
   0x3   :  { %s240_s18 = smov 8  }
   0x4   :  { %22 = dma.hbm_to_vmem [thread:$0]  %s15_s14, 512, %s17_s16, [#allocation3], %s239_s17, %s239_s17, %s240_s18  }
   0x5   :  { %234 = dma.done.wait [#allocation3], 512  }
   0x6   :  { %235 = vsyncadd [#allocation3], 4294966784  ;;  %vm35_vm0 = vcmask 523264   ;;  %v268_v0 = vld [vmem:[#allocation2 + $0x10] sm:$0xff]  ;;  %v31_v1 = vld [vmem:[#allocation2] sm:$0xff]  ;;  %v54_v10 = vlaneseq  ;;  %vm59_vm1 = vcmask 130112  }
   0x7   :  { %v42_v2 = vsel %vm35_vm0, %v268_v0, 0.0  ;;  %v36_v3 = vsel %vm35_vm0, %v31_v1, 0.0  ;;  %v273_v4 = vld [vmem:[#allocation2 + $0x18] sm:$0xff]  ;;  %v32_v5 = vld [vmem:[#allocation2 + $0x8] sm:$0xff]  ;;  %v48_v9 = vld [vmem:[%s300_s1] sm:$0xff]  ;;  %vm64_vm2 = vcmask 1041409  }
   0x8   :  { %43 = vadd.xlane.f32.xlu1 %v42_v2  ;;  %37 = vadd.xlane.f32.xlu0 %v36_v3  ;;  %v45_v6 = vsel %vm35_vm0, %v273_v4, 0.0  ;;  %v39_v7 = vsel %vm35_vm0, %v32_v5, 0.0  ;;  %v49_v8 = vld [vmem:[%s300_s1 + $0x8] sm:$0xff]  ;;  %v55_v13 = vand.u32 127, %v54_v10  ;;  %vm66_vm3 = vcmask 130048   ;;  %s161_s26 = sshll.u32 %s302_s3, 4  ;;  %s162_s26 = int_to_ptr.hbm [resolvable:$true] %s161_s26 }
   0x9   :  { %83 = vmatpush.msra.mxu0 %v49_v8  ;;  %v90_v24 = vld [vmem:[%s301_s2] sm:$0xf]  ;;  %vm95_vm4 = vcmask 1043456   ;;  %vm91_vm5 = vcmask 31744   ;;  %v123_v27 = vshrl.u32 %v54_v10, 7  ;;  %s241_s2 = smov [#allocation5]  }
   0xa   :  { %v57_v14 = vadd.s32 4294967288, %v55_v13  ;;  %175 = vmatpush.msk.msra.mxu1 %vm95_vm4, %v90_v24  ;;  %s159_s23 = sshll.u32 %s241_s2, 4  ;;  %s160_s23 = int_to_ptr.vmem [resolvable:$true] %s159_s23 }
   0xb   :  { %84 = vmatpush.msra.mxu0 %v48_v9  ;;  %183 = vset.pattern.permute.xlu0 %v123_v27  ;;  %v130_v28 = vadd.s32 8, %v123_v27 }
   0xc   :  { %181 = vset.pattern.permute.xlu2 %v123_v27 }
   0xd   :  { %184 = vset.pattern.permute.xlu1 %v130_v28 }
  0x10   :  { %46 = vadd.xlane.f32.xlu1 %v45_v6  ;;  %40 = vadd.xlane.f32.xlu0 %v39_v7 }
  0x7b   :  { %v44_v11 = vpop.xlane.xlu1 %43  ;;  %v38_v12 = vpop.xlane.xlu0 %37 }
  0x7c   :  { %v61_v17 = vperm.slane %v44_v11, %v55_v13  ;;  %v56_v18 = vperm.slane %v38_v12, %v55_v13 }
  0x83   :  { %v47_v15 = vpop.xlane.xlu1 %46  ;;  %v41_v16 = vpop.xlane.xlu0 %40 }
  0x84   :  { %v62_v19 = vperm.slane %v47_v15, %v57_v14  ;;  %v58_v20 = vperm.slane %v41_v16, %v57_v14 }
  0x86   :  { %v60_v21 = vsel %vm59_vm1, %v58_v20, %v56_v18  ;;  %v63_v22 = vsel %vm59_vm1, %v62_v19, %v61_v17 }
  0x87   :  { %v65_v23 = vsel %vm64_vm2, %v63_v22, %v60_v21 }
  0x88   :  { %174 = vmatmul.msk.f32.vlgmr.msra.gmra.mxu0 %vm66_vm3, %v65_v23 }
 0x105   :  { %v86_v25 = vpop.f32.mrf.mxu0 }
 0x106   :  { %v89_v26 = vmax.f32 %v86_v25, 0.0 }
 0x108   :  { %176 = vmatmul.msk.f32.vlgmr.msra.gmra.mxu1 %vm91_vm5, %v89_v26 }
 0x185   :  { %v116_v29 = vpop.f32.mrf.mxu1 }
 0x186   :  { %v117_v30 = vadd.f32 0.5, %v116_v29 }
 0x188   :  { %v119_v31 = vmax.f32 %v117_v30, 0.0 }
 0x18a   :  { %v120_v32 = vmin.f32 %v119_v31, 1.0 }
 0x18c   :  { %v134_v33 = vperm.slane %v120_v32, 1  ;;  %v121_v34 = vperm.slane %v120_v32, 0 }
 0x18e   :  { %145 = vperm.xlu1 %184, %v134_v33   ;;  %139 = vperm.xlu0 %183, %v134_v33  }
 0x18f   :  { %126 = vperm.xlu2 %181, %v121_v34  }
 0x196   :  { %185 = vset.pattern.permute.xlu0 %v130_v28 }
 0x197   :  { %182 = vset.pattern.permute.xlu2 %v130_v28 }
 0x19f   :  { %132 = vperm.xlu2 %182, %v121_v34  }
 0x1e9   :  { %v127_v35 = vpop.permute.xlu2 %126 }
 0x1ea   :  { %v147_v36 = vmul.f32 %v127_v35, %v31_v1 }
 0x1ec   :  { %151 = vst.msk [vmem:[#allocation5] sm:$0xff] %vm35_vm0, %v147_v36 }
 0x1f9   :  { %v133_v37 = vpop.permute.xlu2 %132 }
 0x1fa   :  { %v148_v38 = vmul.f32 %v133_v37, %v32_v5 }
 0x1fc   :  { %152 = vst.msk [vmem:[#allocation5 + $0x8] sm:$0xff] %vm35_vm0, %v148_v38 }
 0x200   :  { %v146_v39 = vpop.permute.xlu1 %145  ;;  %v140_v40 = vpop.permute.xlu0 %139 }
 0x201   :  { %v150_v41 = vmul.f32 %v146_v39, %v273_v4  ;;  %v149_v42 = vmul.f32 %v140_v40, %v268_v0 }
 0x203   :  { %154 = vst.msk [vmem:[#allocation5 + $0x18] sm:$0xff] %vm35_vm0, %v150_v41 }
 0x204   :  { %153 = vst.msk [vmem:[#allocation5 + $0x10] sm:$0xff] %vm35_vm0, %v149_v42 }
 0x205   :  { %167 = dma.vmem_to_hbm [thread:$0]  %s160_s23, 512, %s162_s26, [#allocation4], %s239_s17, %s239_s17, %s240_s18  }
 0x206   :  { %236 = dma.done.wait [#allocation4], 512  }
 0x207   :  { %237 = vsyncadd [#allocation4], 4294966784 }
 0x208   :  { %172 = vsyncpa [#allocation3], 1 }
 0x209   :  { %173 = vsyncpa [#allocation4], 1 }

</bundles_post_ra>
